<compile_context>
chip_gen: v7x
topology: tpu7x:2x2x1
jax: 0.10.0
libtpu: 0.0.40
codegen_flags: <defaults>
</compile_context>

<pallas_src>
import functools

import jax
import jax.numpy as jnp
import numpy as np
from jax import lax
from jax.experimental import pallas as pl
from jax.experimental.pallas import tpu as pltpu


# --------------------------------------------------------------------------------------
# VMEM budget / tiling helpers
# --------------------------------------------------------------------------------------
def _round_up(x, m):
    return ((x + m - 1) // m) * m


@functools.lru_cache(maxsize=None)
def _vmem_capacity_bytes():
    try:
        return int(pltpu.get_tpu_info().vmem_capacity_bytes)
    except Exception:
        return 64 * 1024 * 1024  # conservative (v7x per-TensorCore) fallback


def _vmem_limit_bytes():
    cap = _vmem_capacity_bytes()
    # Never above 64 MiB (v7x physical per-core), never below the 32 MiB default.
    return max(32 * 1024 * 1024, min(cap * 3 // 4, 64 * 1024 * 1024))


def _chunk_budget_bytes():
    cap = _vmem_capacity_bytes()
    # Target block footprint well under the scoped limit to leave pipelining headroom.
    return max(8 * 1024 * 1024, min(cap * 2 // 5, 40 * 1024 * 1024))


def _row_tile(rows, fin, gcols):
    # Kernel-1 row tile: full array if small, else the biggest 512-or-smaller tile whose
    # double-buffered x (f32) + gx (bf16) blocks fit the chunk budget.
    if rows <= 512:
        return rows
    rt = 512
    budget = _chunk_budget_bytes()
    while rt > 64 and 2 * rt * (fin * 4 + gcols * 2) > budget:
        rt //= 2
    return rt


def _choose_rollout_tiles(T, N, H, G):
    # Budget-driven (time_chunk, batch_tile) for the recurrence kernel.
    budget = _chunk_budget_bytes()
    if N <= 8:
        nb = N
    else:
        # >= 2 blocks on the "parallel" batch axis so both v7x TensorCores get work.
        nb = min(256, _round_up(pl.cdiv(N, 2), 8))

    def fits(tc, nb_):
        gx = 2 * tc * nb_ * G * 2          # bf16 gates_x chunk, double-buffered
        mk = 2 * tc * nb_ * 4              # f32 masks chunk
        y = 2 * tc * nb_ * H * 4           # f32 output chunk
        whh = 2 * H * G * 2                # bf16 W_hh^T (double-buffered)
        carry = 2 * 4 * nb_ * H * 4        # h0, c0, hT, cT
        return gx + mk + y + whh + carry <= budget

    tc = min(T, 64)
    while tc > 1 and not fits(tc, nb):
        tc = max(1, tc // 2)
    while nb > 8 and not fits(tc, nb):
        nb = max(8, _round_up(nb // 2, 8))
    return tc, nb


# --------------------------------------------------------------------------------------
# Parameter prep: permute gate columns (i,f,g,o) -> (i,f,o,g), cast weights to bf16 once.
# --------------------------------------------------------------------------------------
def prepare_params(params):
    H = params["whh_t"].shape[1] // 4

    def reorder(w):  # last-axis gate columns: [i, f, g, o] -> [i, f, o, g]
        return jnp.concatenate([w[..., :2 * H], w[..., 3 * H:], w[..., 2 * H:3 * H]], axis=-1)

    return {
        "base_w": params["base_w"].astype(jnp.bfloat16),
        "base_b": params["base_b"].astype(jnp.float32),
        "wih_t": reorder(params["wih_t"]).astype(jnp.bfloat16),
        "whh_t": reorder(params["whh_t"]).astype(jnp.bfloat16),
        "bias": reorder(params["bias"]).astype(jnp.float32),
    }


# --------------------------------------------------------------------------------------
# Kernel 1: fused base MLP + hoisted LSTM input projection (row-parallel, bf16 MXU).
#   gates_x = relu( relu(x) @ W_base + b_base ) @ W_ih^T + (b_ih + b_hh)   (stored bf16)
# --------------------------------------------------------------------------------------
def _base_xproj_kernel(x_ref, bw_ref, bb_ref, wih_ref, lb_ref, gx_ref):
    a = jnp.maximum(x_ref[...], 0.0)                                    # act_fn (pre)
    a = jnp.dot(a.astype(bw_ref.dtype), bw_ref[...],
                preferred_element_type=jnp.float32) + bb_ref[...]
    a = jnp.maximum(a, 0.0)                                             # act_fn (post)
    gx = jnp.dot(a.astype(wih_ref.dtype), wih_ref[...],
                 preferred_element_type=jnp.float32) + lb_ref[...]      # bias add in f32
    gx_ref[...] = gx.astype(gx_ref.dtype)                               # downcast to bf16


def base_xproj_forward(x, base_w, base_b, wih_t, lstm_b):
    R, Fin = x.shape
    G = wih_t.shape[1]
    rt = _row_tile(R, Fin, G)
    return pl.pallas_call(
        _base_xproj_kernel,
        out_shape=jax.ShapeDtypeStruct((R, G), jnp.bfloat16),
        grid=(pl.cdiv(R, rt),),
        in_specs=[
            pl.BlockSpec((rt, Fin), lambda i: (i, 0)),
            pl.BlockSpec(base_w.shape, lambda i: (0, 0)),
            pl.BlockSpec(base_b.shape, lambda i: (0, 0)),
            pl.BlockSpec(wih_t.shape, lambda i: (0, 0)),
            pl.BlockSpec(lstm_b.shape, lambda i: (0, 0)),
        ],
        out_specs=pl.BlockSpec((rt, G), lambda i: (i, 0)),
        compiler_params=pltpu.CompilerParams(
            dimension_semantics=("parallel",),
            vmem_limit_bytes=_vmem_limit_bytes()),
    )(x, base_w, base_b, wih_t, lstm_b)


# --------------------------------------------------------------------------------------
# Kernel 2: chunked masked LSTM recurrence.
# grid = (batch "parallel", time "arbitrary").  hT/cT output blocks are the carry
# (constant index_map over the time axis); gates_x/masks/y blocks are chunk-resident.
# Gate column order after prepare_params: i, f, o, g.
# --------------------------------------------------------------------------------------
def _lstm_chunk_kernel(gx_ref, m_ref, whh_ref, h0_ref, c0_ref, y_ref, hT_ref, cT_ref,
                       *, seq_len, unroll):
    @pl.when(pl.program_id(1) == 0)
    def _():
        hT_ref[...] = h0_ref[...]
        cT_ref[...] = c0_ref[...]

    H = hT_ref.shape[-1]
    H3 = 3 * H
    tc = gx_ref.shape[0]
    guarded = (seq_len % tc) != 0
    t_base = pl.program_id(1) * tc
    whh = whh_ref[...]                      # (H, 4H) bf16, VMEM-resident

    def step(t, carry):
        h, c = carry
        m = m_ref[t]                        # (NB, 1); 0/1 mask resets the state
        hm = h * m
        cm = c * m
        gates = gx_ref[t].astype(jnp.float32) + jnp.dot(
            hm.astype(whh.dtype), whh, preferred_element_type=jnp.float32)   # (NB, 4H)
        # Sigmoid only over the i/f/o three-quarters; tanh over the g quarter.
        sig = jax.nn.sigmoid(gates[:, :H3])
        i_g = sig[:, 0:H]
        f_g = sig[:, H:2 * H]
        o_g = sig[:, 2 * H:H3]
        g_g = jnp.tanh(gates[:, H3:])
        c_new = f_g * cm + i_g * g_g        # f32 cell state
        h_new = o_g * jnp.tanh(c_new)
        if guarded:                         # partial last time chunk: keep old carry
            valid = (t_base + t) < seq_len
            h_new = jnp.where(valid, h_new, h)
            c_new = jnp.where(valid, c_new, c)
        y_ref[t] = h_new                    # chunk block; DMA'd to HBM once per chunk
        return (h_new, c_new)

    h, c = lax.fori_loop(0, tc, step, (hT_ref[...], cT_ref[...]), unroll=unroll)
    hT_ref[...] = h                         # carry written once per chunk, not per step
    cT_ref[...] = c


def lstm_rollout(gates_x, masks, h0, c0, whh_t):
    T, N, G = gates_x.shape
    H = h0.shape[1]
    tc, nb = _choose_rollout_tiles(T, N, H, G)
    grid = (pl.cdiv(N, nb), pl.cdiv(T, tc))     # (batch "parallel", time "arbitrary")
    kernel = functools.partial(_lstm_chunk_kernel, seq_len=T, unroll=min(tc, 8))
    return pl.pallas_call(
        kernel,
        out_shape=(
            jax.ShapeDtypeStruct((T, N, H), jnp.float32),
            jax.ShapeDtypeStruct((N, H), jnp.float32),
            jax.ShapeDtypeStruct((N, H), jnp.float32),
        ),
        grid=grid,
        in_specs=[
            pl.BlockSpec((tc, nb, G), lambda b, t: (t, b, 0)),   # gates_x chunk (bf16)
            pl.BlockSpec((tc, nb, 1), lambda b, t: (t, b, 0)),   # masks chunk
            pl.BlockSpec((H, G), lambda b, t: (0, 0)),           # W_hh^T (bf16)
            pl.BlockSpec((nb, H), lambda b, t: (b, 0)),          # h0
            pl.BlockSpec((nb, H), lambda b, t: (b, 0)),          # c0
        ],
        out_specs=[
            pl.BlockSpec((tc, nb, H), lambda b, t: (t, b, 0)),   # y
            pl.BlockSpec((nb, H), lambda b, t: (b, 0)),          # h_T (carry)
            pl.BlockSpec((nb, H), lambda b, t: (b, 0)),          # c_T (carry)
        ],
        compiler_params=pltpu.CompilerParams(
            dimension_semantics=("parallel", "arbitrary"),
            vmem_limit_bytes=_vmem_limit_bytes()),
    )(gates_x, masks, whh_t, h0, c0)


# --------------------------------------------------------------------------------------
# Kernel 3: fused decode path (T == 1): base MLP + x-projection + one LSTM cell.
# Outputs only (h1, c1); the LSTM output y equals h1.
# --------------------------------------------------------------------------------------
def _decode_kernel(x_ref, m_ref, h0_ref, c0_ref, bw_ref, bb_ref, wih_ref, whh_ref, lb_ref,
                   h1_ref, c1_ref):
    a = jnp.maximum(x_ref[...], 0.0)
    a = jnp.dot(a.astype(bw_ref.dtype), bw_ref[...],
                preferred_element_type=jnp.float32) + bb_ref[...]
    a = jnp.maximum(a, 0.0)
    gx = jnp.dot(a.astype(wih_ref.dtype), wih_ref[...],
                 preferred_element_type=jnp.float32) + lb_ref[...]

    m = m_ref[...]                          # (N, 1)
    h = h0_ref[...] * m
    c = c0_ref[...] * m
    gates = gx + jnp.dot(h.astype(whh_ref.dtype), whh_ref[...],
                         preferred_element_type=jnp.float32)
    H = h0_ref.shape[-1]
    H3 = 3 * H
    sig = jax.nn.sigmoid(gates[:, :H3])
    i_g = sig[:, 0:H]
    f_g = sig[:, H:2 * H]
    o_g = sig[:, 2 * H:H3]
    g_g = jnp.tanh(gates[:, H3:])
    c1 = f_g * c + i_g * g_g
    h1 = o_g * jnp.tanh(c1)
    h1_ref[...] = h1
    c1_ref[...] = c1


def decode_step(x, masks, h0, c0, base_w, base_b, wih_t, whh_t, lstm_b):
    N, Fin = x.shape
    H = h0.shape[1]
    # TODO(synk): could alias h0/c0 -> h1/c1 via input_output_aliases to update the state in
    # place, but that donates the caller's buffers; copy-out semantics kept here.
    return pl.pallas_call(
        _decode_kernel,
        out_shape=(
            jax.ShapeDtypeStruct((N, H), jnp.float32),
            jax.ShapeDtypeStruct((N, H), jnp.float32),
        ),
        grid=(1,),
        in_specs=[
            pl.BlockSpec((N, Fin), lambda i: (0, 0)),
            pl.BlockSpec((N, 1), lambda i: (0, 0)),
            pl.BlockSpec((N, H), lambda i: (0, 0)),
            pl.BlockSpec((N, H), lambda i: (0, 0)),
            pl.BlockSpec(base_w.shape, lambda i: (0, 0)),
            pl.BlockSpec(base_b.shape, lambda i: (0, 0)),
            pl.BlockSpec(wih_t.shape, lambda i: (0, 0)),
            pl.BlockSpec(whh_t.shape, lambda i: (0, 0)),
            pl.BlockSpec(lstm_b.shape, lambda i: (0, 0)),
        ],
        out_specs=[
            pl.BlockSpec((N, H), lambda i: (0, 0)),
            pl.BlockSpec((N, H), lambda i: (0, 0)),
        ],
    )(x, masks, h0, c0, base_w, base_b, wih_t, whh_t, lstm_b)


# --------------------------------------------------------------------------------------
# RecurrentNet.forward glue (reshapes in plain JAX, hot paths in the kernels above).
# Takes params already processed by prepare_params() (bf16 weights, gates reordered).
# --------------------------------------------------------------------------------------
def recurrent_net_forward(prepared, x, hxs, masks, horizon_length):
    h, c = hxs
    N, H = h.shape
    bw, bb = prepared["base_w"], prepared["base_b"]
    wih, whh, bias = prepared["wih_t"], prepared["whh_t"], prepared["bias"]

    if x.shape[0] == N:
        # Single-step (decode) path: one fused kernel; y == h1.
        h1, c1 = decode_step(x, masks.reshape(N, 1), h, c, bw, bb, wih, whh, bias)
        return h1, (h1, c1)
    else:
        # Rollout path: replicate the torch reshapes exactly.
        T = x.shape[0] // N
        N_ = T // horizon_length
        N_new = N * N_
        T_new = horizon_length
        # Hoisted input projection for ALL timesteps (base + x @ W_ih^T + bias), one kernel.
        gx = base_xproj_forward(x, bw, bb, wih, bias)        # (T_new*N_new, 4H) bf16
        gx = gx.reshape(T_new, N_new, 4 * H)
        m = masks.reshape(T_new, N_new, 1)
        h = jnp.repeat(h[None], N_, axis=0).reshape(N_new, H)
        c = jnp.repeat(c[None], N_, axis=0).reshape(N_new, H)
        # Per-timestep 0/1 masking inside the kernel == the has_zeros segmentation in torch.
        y, hT, cT = lstm_rollout(gx, m, h, c, whh)
        return y.reshape(T_new * N_new, H), (hT, cT)


# --------------------------------------------------------------------------------------
# Pure-JAX reference (same bf16-on-MXU / f32-accumulate / bf16-gx math, same gate order)
# --------------------------------------------------------------------------------------
def _mm(a, w):
    return jnp.dot(a.astype(jnp.bfloat16), w.astype(jnp.bfloat16),
                   preferred_element_type=jnp.float32)


def _ref_forward(prepared, x, hxs, masks, horizon_length):
    a = jnp.maximum(x, 0.0)
    a = jnp.maximum(_mm(a, prepared["base_w"]) + prepared["base_b"], 0.0)
    gx_all = (_mm(a, prepared["wih_t"]) + prepared["bias"]).astype(jnp.bfloat16)
    h, c = hxs
    N, H = h.shape
    if x.shape[0] == N:
        gxs = gx_all[None]
        ms = masks.reshape(1, N, 1)
    else:
        T = x.shape[0] // N
        N_ = T // horizon_length
        Nn, Tn = N * N_, horizon_length
        gxs = gx_all.reshape(Tn, Nn, 4 * H)
        ms = masks.reshape(Tn, Nn, 1)
        h = jnp.repeat(h[None], N_, axis=0).reshape(Nn, H)
        c = jnp.repeat(c[None], N_, axis=0).reshape(Nn, H)

    ys = []
    for t in range(gxs.shape[0]):
        h = h * ms[t]
        c = c * ms[t]
        g = gxs[t].astype(jnp.float32) + _mm(h, prepared["whh_t"])
        i_g = jax.nn.sigmoid(g[:, 0 * H:1 * H])
        f_g = jax.nn.sigmoid(g[:, 1 * H:2 * H])
        o_g = jax.nn.sigmoid(g[:, 2 * H:3 * H])
        g_g = jnp.tanh(g[:, 3 * H:4 * H])
        c = f_g * c + i_g * g_g
        h = o_g * jnp.tanh(c)
        ys.append(h)
    y = jnp.stack(ys, 0)
    y = y[0] if x.shape[0] == hxs[0].shape[0] else y.reshape(-1, H)
    return y, (h, c)


if __name__ == "__main__":
    INPUT_SIZE = 32
    FC_SIZE = 32
    HIDDEN = 32
    HORIZON = 4
    N_ENV = 2          # number of parallel envs (size of hxs)
    T_TOTAL = 8        # rollout length (T_TOTAL // HORIZON = 2 "repeat" groups)

    key = jax.random.PRNGKey(0)
    ks = jax.random.split(key, 10)

    # Raw params in the torch LSTM gate order (i, f, g, o).
    params = {
        "base_w": 0.1 * jax.random.normal(ks[0], (INPUT_SIZE, FC_SIZE), jnp.float32),
        "base_b": 0.1 * jax.random.normal(ks[1], (1, FC_SIZE), jnp.float32),
        "wih_t":  0.1 * jax.random.normal(ks[2], (FC_SIZE, 4 * HIDDEN), jnp.float32),
        "whh_t":  0.1 * jax.random.normal(ks[3], (HIDDEN, 4 * HIDDEN), jnp.float32),
        "bias":   0.1 * jax.random.normal(ks[4], (1, 4 * HIDDEN), jnp.float32),
    }
    prepared = prepare_params(params)   # bf16 casts + (i,f,o,g) reorder, done once

    # Rollout-path inputs: x is (T_total * N_env, input_size), masks has a zero row.
    x_roll = jax.random.normal(ks[5], (T_TOTAL * N_ENV, INPUT_SIZE), jnp.float32)
    masks_roll = jnp.ones((T_TOTAL * N_ENV, 1), jnp.float32).at[6, 0].set(0.0)
    h0 = jax.random.normal(ks[6], (N_ENV, HIDDEN), jnp.float32)
    c0 = jax.random.normal(ks[7], (N_ENV, HIDDEN), jnp.float32)

    fwd = functools.partial(recurrent_net_forward, horizon_length=HORIZON)

    y_roll, (hT, cT) = fwd(prepared, x_roll, (h0, c0), masks_roll)
    jax.block_until_ready((y_roll, hT, cT))

    # Single-step (decode) path: x has N_env rows.
    x_step = jax.random.normal(ks[8], (N_ENV, INPUT_SIZE), jnp.float32)
    masks_step = jnp.ones((N_ENV, 1), jnp.float32)
    y_step, (h1, c1) = fwd(prepared, x_step, (h0, c0), masks_step)
    jax.block_until_ready((y_step, h1, c1))

    # Correctness check against a pure-JAX reference using the same bf16/f32 math.
    yr, (hr, cr) = _ref_forward(prepared, x_roll, (h0, c0), masks_roll, HORIZON)
    np.testing.assert_allclose(np.asarray(y_roll), np.asarray(yr), atol=5e-3, rtol=5e-3)
    np.testing.assert_allclose(np.asarray(hT), np.asarray(hr), atol=5e-3, rtol=5e-3)
    np.testing.assert_allclose(np.asarray(cT), np.asarray(cr), atol=5e-3, rtol=5e-3)
    ys, (hs, cs) = _ref_forward(prepared, x_step, (h0, c0), masks_step, HORIZON)
    np.testing.assert_allclose(np.asarray(y_step), np.asarray(ys), atol=5e-3, rtol=5e-3)
    np.testing.assert_allclose(np.asarray(c1), np.asarray(cs), atol=5e-3, rtol=5e-3)

    print("KERNEL_OK")
</pallas_src>

<mosaic_0001>
module attributes {stable_mosaic.version = 11 : i64} {
  func.func @_base_xproj_kernel(%arg0: i32, %arg1: memref<16x32xf32, #tpu.memory_space<vmem>>, %arg2: memref<32x32xbf16, #tpu.memory_space<vmem>>, %arg3: memref<1x32xf32, #tpu.memory_space<vmem>>, %arg4: memref<32x128xbf16, #tpu.memory_space<vmem>>, %arg5: memref<1x128xf32, #tpu.memory_space<vmem>>, %arg6: memref<16x128xbf16, #tpu.memory_space<vmem>>) attributes {dimension_semantics = [#tpu.dimension_semantics<parallel>], iteration_bounds = array<i64: 1>, scalar_prefetch = 0 : i64, scratch_operands = 0 : i64, tpu.core_type = #tpu.core_type<tc>, window_params = [{transform_indices = @transform_0, window_bounds = array<i64: 16, 32>}, {pipeline_mode = #tpu.pipeline_mode<synchronous>, transform_indices = @transform_1, window_bounds = array<i64: 32, 32>}, {pipeline_mode = #tpu.pipeline_mode<synchronous>, transform_indices = @transform_2, window_bounds = array<i64: 1, 32>}, {pipeline_mode = #tpu.pipeline_mode<synchronous>, transform_indices = @transform_3, window_bounds = array<i64: 32, 128>}, {pipeline_mode = #tpu.pipeline_mode<synchronous>, transform_indices = @transform_4, window_bounds = array<i64: 1, 128>}, {transform_indices = @transform_5, window_bounds = array<i64: 16, 128>}]} {
    %c0 = arith.constant 0 : index
    %c0_0 = arith.constant 0 : index
    %0 = vector.load %arg1[%c0, %c0_0] : memref<16x32xf32, #tpu.memory_space<vmem>>, vector<16x32xf32>
    %cst = arith.constant 0.000000e+00 : f32
    %1 = vector.broadcast %cst : f32 to vector<16x32xf32>
    %2 = arith.maximumf %0, %1 : vector<16x32xf32>
    %3 = arith.truncf %2 : vector<16x32xf32> to vector<16x32xbf16>
    %c0_1 = arith.constant 0 : index
    %c0_2 = arith.constant 0 : index
    %4 = vector.load %arg2[%c0_1, %c0_2] : memref<32x32xbf16, #tpu.memory_space<vmem>>, vector<32x32xbf16>
    %cst_3 = arith.constant dense<0.000000e+00> : vector<16x32xf32>
    %5 = tpu.matmul %3, %4, %cst_3 {dimension_numbers = #tpu.dot_dimension_numbers<[1], [0], [0], [1], [0, 0, 1, 1], [], []>} : vector<16x32xbf16>, vector<32x32xbf16>, vector<16x32xf32> -> vector<16x32xf32>
    %c0_4 = arith.constant 0 : index
    %c0_5 = arith.constant 0 : index
    %6 = vector.load %arg3[%c0_4, %c0_5] : memref<1x32xf32, #tpu.memory_space<vmem>>, vector<1x32xf32>
    %7 = vector.broadcast %6 : vector<1x32xf32> to vector<16x32xf32>
    %8 = arith.addf %5, %7 : vector<16x32xf32>
    %cst_6 = arith.constant 0.000000e+00 : f32
    %9 = vector.broadcast %cst_6 : f32 to vector<16x32xf32>
    %10 = arith.maximumf %8, %9 : vector<16x32xf32>
    %11 = arith.truncf %10 : vector<16x32xf32> to vector<16x32xbf16>
    %c0_7 = arith.constant 0 : index
    %c0_8 = arith.constant 0 : index
    %12 = vector.load %arg4[%c0_7, %c0_8] : memref<32x128xbf16, #tpu.memory_space<vmem>>, vector<32x128xbf16>
    %cst_9 = arith.constant dense<0.000000e+00> : vector<16x128xf32>
    %13 = tpu.matmul %11, %12, %cst_9 {dimension_numbers = #tpu.dot_dimension_numbers<[1], [0], [0], [1], [0, 0, 1, 1], [], []>} : vector<16x32xbf16>, vector<32x128xbf16>, vector<16x128xf32> -> vector<16x128xf32>
    %c0_10 = arith.constant 0 : index
    %c0_11 = arith.constant 0 : index
    %14 = vector.load %arg5[%c0_10, %c0_11] : memref<1x128xf32, #tpu.memory_space<vmem>>, vector<1x128xf32>
    %15 = vector.broadcast %14 : vector<1x128xf32> to vector<16x128xf32>
    %16 = arith.addf %13, %15 : vector<16x128xf32>
    %17 = arith.truncf %16 : vector<16x128xf32> to vector<16x128xbf16>
    %c0_12 = arith.constant 0 : index
    %c0_13 = arith.constant 0 : index
    %18 = vector.load %arg6[%c0_12, %c0_13] : memref<16x128xbf16, #tpu.memory_space<vmem>>, vector<16x128xbf16>
    tpu.vector_store %arg6[%c0_12, %c0_13], %17 {strides = array<i32>} : memref<16x128xbf16, #tpu.memory_space<vmem>>, vector<16x128xbf16>,
    return
  }
  func.func @transform_0(%arg0: i32) -> (i32, i32) {
    %c0_i32 = arith.constant 0 : i32
    %c0_i32_0 = arith.constant 0 : i32
    return %arg0, %c0_i32 : i32, i32
  }
  func.func @transform_1(%arg0: i32) -> (i32, i32) {
    %c0_i32 = arith.constant 0 : i32
    %c0_i32_0 = arith.constant 0 : i32
    %c0_i32_1 = arith.constant 0 : i32
    return %c0_i32, %c0_i32_0 : i32, i32
  }
  func.func @transform_2(%arg0: i32) -> (i32, i32) {
    %c0_i32 = arith.constant 0 : i32
    %c0_i32_0 = arith.constant 0 : i32
    %c0_i32_1 = arith.constant 0 : i32
    return %c0_i32, %c0_i32_0 : i32, i32
  }
  func.func @transform_3(%arg0: i32) -> (i32, i32) {
    %c0_i32 = arith.constant 0 : i32
    %c0_i32_0 = arith.constant 0 : i32
    %c0_i32_1 = arith.constant 0 : i32
    return %c0_i32, %c0_i32_0 : i32, i32
  }
  func.func @transform_4(%arg0: i32) -> (i32, i32) {
    %c0_i32 = arith.constant 0 : i32
    %c0_i32_0 = arith.constant 0 : i32
    %c0_i32_1 = arith.constant 0 : i32
    return %c0_i32, %c0_i32_0 : i32, i32
  }
  func.func @transform_5(%arg0: i32) -> (i32, i32) {
    %c0_i32 = arith.constant 0 : i32
    %c0_i32_0 = arith.constant 0 : i32
    return %arg0, %c0_i32 : i32, i32
  }
}

</mosaic_0001>

<bundles_post_ra>
// kernel: tpu_custom_call.1
= control target key start
LH: loop header
LB: loop body
LE: loop exit
PB: predicated region body
PF: predicated region fallthrough
CT: control target
= control target key end

     0   :  { %10 = vsyncpa [#allocation3], 0  ;;  %s486_s0 = inlined_call_operand.hbm [shape: f32[16,32], index: 0, kind: input, shape index: {}]   ;;  %s487_s1 = inlined_call_operand.hbm [shape: bf16[32,32], index: 1, kind: input, shape index: {}]   ;;  %s488_s2 = inlined_call_operand.vmem [shape: f32[1,32], index: 2, kind: input, shape index: {}]   ;;  %s489_s3 = inlined_call_operand.hbm [shape: bf16[32,128], index: 3, kind: input, shape index: {}]   ;;  %s490_s4 = inlined_call_operand.vmem [shape: f32[1,128], index: 4, kind: input, shape index: {}]   ;;  %s491_s5 = inlined_call_operand.hbm [shape: bf16[16,128], index: 5, kind: output, shape index: {}]  }
   0x1   :  { %11 = vsyncpa [#allocation6], 0 }
   0x2   :  { %12 = vsyncpa [#allocation4], 0  ;;  %s381_s18 = smov [#allocation5]   ;;  %s287_s22 = scalar_lea.hbm %s487_s1, 256 }
   0x3   :  { %s30_s19 = sshll.u32 %s381_s18, 4  ;;  %p288_p0 = scmp.ne.s32.totalorder %s487_s1, %s287_s22  ;;  %s31_s19 = int_to_ptr.vmem [resolvable:$true] %s30_s19 }
   0x4   :  { %p291_p1 = scmp.lt.u32.totalorder %s287_s22, %s487_s1 }
   0x6   :  { %p293_p2 = pnand %p291_p1, %p288_p0 }
   0x8   :  { %296 = shalt.err (!%p293_p2)
}
   0x9   :  { %s297_s27 = scalar_lea.vmem %s31_s19, 256  ;;  %p302_p4 = scmp.lt.s32.totalorder %s31_s19, %s31_s19 }
   0xa   :  { %p298_p3 = scmp.ne.s32.totalorder %s31_s19, %s297_s27  ;;  %p303_p5 = scmp.lt.s32.totalorder %s297_s27, %s297_s27 }
   0xc   :  { %p304_p6 = por %p303_p5, %p302_p4 }
   0xe   :  { %p305_p7 = pnand %p304_p6, %p298_p3 }
  0x10   :  { %308 = shalt.err (!%p305_p7)
}
  0x11   :  { %s382_s28 = smov 64   ;;  %s383_s29 = smov 4  }
  0x12   :  { %36 = dma.hbm_to_vmem [thread:$0]  %s487_s1, 256, %s31_s19, [#allocation6], %s382_s28, %s382_s28, %s383_s29  }
  0x13   :  { %s384_s7 = smov [#allocation2]   ;;  %s309_s11 = scalar_lea.hbm %s486_s0, 256 }
  0x14   :  { %s18_s8 = sshll.u32 %s384_s7, 4  ;;  %p310_p8 = scmp.ne.s32.totalorder %s486_s0, %s309_s11  ;;  %s19_s8 = int_to_ptr.vmem [resolvable:$true] %s18_s8 }
  0x15   :  { %p313_p9 = scmp.lt.u32.totalorder %s309_s11, %s486_s0 }
  0x17   :  { %p315_p10 = pnand %p313_p9, %p310_p8 }
  0x19   :  { %318 = shalt.err (!%p315_p10)
}
  0x1a   :  { %s319_s16 = scalar_lea.vmem %s19_s8, 256  ;;  %p324_p12 = scmp.lt.s32.totalorder %s19_s8, %s19_s8 }
  0x1b   :  { %p320_p11 = scmp.ne.s32.totalorder %s19_s8, %s319_s16  ;;  %p325_p13 = scmp.lt.s32.totalorder %s319_s16, %s319_s16 }
  0x1d   :  { %p326_p0 = por %p325_p13, %p324_p12 }
  0x1f   :  { %p327_p1 = pnand %p326_p0, %p320_p11 }
  0x21   :  { %330 = shalt.err (!%p327_p1)
}
  0x22   :  { %s385_s1 = smov 128   ;;  %s386_s17 = smov 8  }
  0x23   :  { %24 = dma.hbm_to_vmem [thread:$0]  %s486_s0, 256, %s19_s8, [#allocation3], %s385_s1, %s385_s1, %s386_s17  }
  0x24   :  { %s387_s20 = smov [#allocation7]   ;;  %s331_s24 = scalar_lea.hbm %s489_s3, 256 }
  0x25   :  { %s44_s21 = sshll.u32 %s387_s20, 4  ;;  %p332_p2 = scmp.ne.s32.totalorder %s489_s3, %s331_s24  ;;  %s45_s21 = int_to_ptr.vmem [resolvable:$true] %s44_s21 }
  0x26   :  { %p335_p3 = scmp.lt.u32.totalorder %s331_s24, %s489_s3 }
  0x28   :  { %p337_p4 = pnand %p335_p3, %p332_p2 }
  0x2a   :  { %340 = shalt.err (!%p337_p4)
}
  0x2b   :  { %s341_s6 = scalar_lea.vmem %s45_s21, 256  ;;  %p346_p6 = scmp.lt.s32.totalorder %s45_s21, %s45_s21 }
  0x2c   :  { %p342_p5 = scmp.ne.s32.totalorder %s45_s21, %s341_s6  ;;  %p347_p7 = scmp.lt.s32.totalorder %s341_s6, %s341_s6 }
  0x2e   :  { %p348_p8 = por %p347_p7, %p346_p6 }
  0x30   :  { %p349_p9 = pnand %p348_p8, %p342_p5 }
  0x32   :  { %352 = shalt.err (!%p349_p9)
}
  0x33   :  { %50 = dma.hbm_to_vmem [thread:$0]  %s489_s3, 256, %s45_s21, [#allocation6], %s382_s28, %s382_s28, %s383_s29  }
  0x34   :  { %375 = dma.done.wait [#allocation3], 256  }
  0x35   :  { %376 = vsyncadd [#allocation3], 4294967040 }
  0x36   :  { %377 = dma.done.wait [#allocation6], 512  }
  0x37   :  { %378 = vsyncadd [#allocation6], 4294966784  ;;  %v388_v0 = vmov 0.0   ;;  %vm389_vm0 = vmmov 0   ;;  %v283_v1 = vld [vmem:[#allocation5] sm:$0xff]   ;;  %v284_v2 = vld [vmem:[#allocation5 + $0x8] sm:$0xff]  }
  0x38   :  { %257 = vmatprep.subr.bf16.mxu0 %v388_v0  ;;  %261 = vmatprep.mubr.msk.bf16.mxu0 %vm389_vm0, %v388_v0  ;;  %v63_v3 = vld [vmem:[#allocation2] sm:$0xff]  ;;  %v64_v4 = vld [vmem:[#allocation2 + $0x8] sm:$0xff]  ;;  %vm91_vm1 = vcmask 261120   ;;  %s390_s11 = smov [#allocation8]  }
  0x39   :  { %265 = vmatprep.subr.bf16.mxu1 %v388_v0  ;;  %269 = vmatprep.mubr.msk.bf16.mxu1 %vm389_vm0, %v388_v0  ;;  %v65_v5 = vmax.f32 %v63_v3, 0.0  ;;  %v66_v6 = vmax.f32 %v64_v4, 0.0  ;;  %v285_v8 = vld [vmem:[#allocation7] sm:$0xff]   ;;  %v286_v9 = vld [vmem:[#allocation7 + $0x8] sm:$0xff]  }
  0x3a   :  { %258 = vmatpush3.bf16.msra.mxu0 %v283_v1  ;;  %266 = vmatpush3.bf16.msra.mxu1 %v285_v8  ;;  %v234_v10 = vld [vmem:[%s488_s2] ss:$0 sm:$0xff]  ;;  %s221_s2 = sshll.u32 %s390_s11, 4  ;;  %s222_s2 = int_to_ptr.vmem [resolvable:$true] %s221_s2 }
  0x3b   :  { %259 = vmatprep.subr.bf16.mxu0 %v388_v0  ;;  %v67_v7 = vpack.c.bf16 %v66_v6, %v65_v5  ;;  %267 = vmatprep.subr.bf16.mxu1 %v388_v0  ;;  %v238_v20 = vld [vmem:[%s490_s4] ss:$0 sm:$0xff]  ;;  %s353_s12 = scalar_lea.vmem %s222_s2, 128  ;;  %p358_p11 = scmp.lt.s32.totalorder %s222_s2, %s222_s2 }
  0x3c   :  { %p354_p10 = scmp.ne.s32.totalorder %s222_s2, %s353_s12  ;;  %p359_p12 = scmp.lt.s32.totalorder %s353_s12, %s353_s12 }
  0x3e   :  { %260 = vmatpush3.bf16.msra.mxu0 %v284_v2  ;;  %268 = vmatpush3.bf16.msra.mxu1 %v286_v9  ;;  %p360_p13 = por %p359_p12, %p358_p11 }
  0x40   :  { %p361_p0 = pnand %p360_p13, %p354_p10 }
  0x41   :  { %262 = vmatmul.mubr.msk.bf16.vlgmr.msra.gmra.mrb[0].mxu0 %vm91_vm1, %v67_v7 }
 0x114   :  { %v129_v11 = vpop.f32.mrb[0].mxu0 }
 0x115   :  { %v130_v12 = vadd.f32 %v234_v10, %v129_v11  ;;  %v263_v13 = vpop.f32.mrb[1].mxu0 }
 0x116   :  { %v132_v14 = vpop.f32.mrb[2].mxu0 }
 0x117   :  { %v133_v15 = vadd.f32 %v234_v10, %v132_v14  ;;  %v264_v16 = vpop.f32.mrb[3].mxu0  ;;  %v136_v17 = vmax.f32 %v130_v12, 0.0 }
 0x119   :  { %v137_v18 = vmax.f32 %v133_v15, 0.0 }
 0x11b   :  { %v138_v19 = vpack.c.bf16 %v137_v18, %v136_v17 }
 0x11d   :  { %270 = vmatmul.mubr.msk.bf16.vlgmr.msra.gmra.mrb[0].mxu1 %vm91_vm1, %v138_v19 }
 0x1f0   :  { %v199_v21 = vpop.f32.mrb[0].mxu1 }
 0x1f1   :  { %v271_v22 = vpop.f32.mrb[1].mxu1  ;;  %v200_v24 = vadd.f32 %v238_v20, %v199_v21 }
 0x1f2   :  { %v202_v23 = vpop.f32.mrb[2].mxu1 }
 0x1f3   :  { %v203_v25 = vadd.f32 %v238_v20, %v202_v23  ;;  %v272_v26 = vpop.f32.mrb[3].mxu1 }
 0x1f5   :  { %v249_v27 = vpack.c.bf16 %v203_v25, %v200_v24 }
 0x1f7   :  { %250 = vst [vmem:[#allocation8] sm:$0xff] %v249_v27  }
 0x1f8   :  { %364 = shalt.err (!%p361_p0)
}
 0x1f9   :  { %s365_s14 = scalar_lea.hbm %s491_s5, 128 }
 0x1fa   :  { %p366_p1 = scmp.ne.s32.totalorder %s491_s5, %s365_s14  ;;  %p369_p2 = scmp.lt.u32.totalorder %s365_s14, %s491_s5 }
 0x1fc   :  { %p371_p3 = pnand %p369_p2, %p366_p1 }
 0x1fe   :  { %374 = shalt.err (!%p371_p3)
}
 0x1ff   :  { %227 = dma.vmem_to_hbm [thread:$0]  %s222_s2, 128, %s491_s5, [#allocation4], %s382_s28, %s382_s28, %s383_s29  }
 0x200   :  { %379 = dma.done.wait [#allocation4], 128  }
 0x201   :  { %380 = vsyncadd [#allocation4], 4294967168 }
 0x202   :  { %231 = vsyncpa [#allocation3], 1 }
 0x203   :  { %232 = vsyncpa [#allocation6], 1 }
 0x204   :  { %233 = vsyncpa [#allocation4], 1 }

</bundles_post_ra>
